<compile_context>
chip_gen: v7x
topology: tpu7x:2x2x1
jax: 0.10.0
libtpu: 0.0.40
codegen_flags: <defaults>
</compile_context>

<pallas_src>
import functools

import jax
import jax.numpy as jnp
import numpy as np
from jax.experimental import pallas as pl
from jax.experimental.pallas import tpu as pltpu


def _round_up(a, m):
    return (a + m - 1) // m * m


# Per-generation resource model: compiler vmem limit, VMEM budget used for block
# sizing, #TensorCores sharing the "parallel" grid axis, native bf16 VPU/EUP.
_GEN_CONFIG = {
    "v5e": dict(vmem_limit=100 * 2**20, vmem_budget=80 * 2**20, n_cores=1, bf16_vpu=False),
    "v6e": dict(vmem_limit=100 * 2**20, vmem_budget=80 * 2**20, n_cores=1, bf16_vpu=True),
    "v7x": dict(vmem_limit=48 * 2**20, vmem_budget=36 * 2**20, n_cores=2, bf16_vpu=True),
    "unknown": dict(vmem_limit=None, vmem_budget=12 * 2**20, n_cores=1, bf16_vpu=False),
}


def _tpu_generation():
    try:
        kind = jax.devices()[0].device_kind.lower()
    except Exception:
        return "unknown"
    if "v5 lite" in kind or "v5e" in kind or "v5lite" in kind:
        return "v5e"
    if "v6" in kind:
        return "v6e"
    if "v7" in kind:
        return "v7x"
    return "unknown"


def _bytes_per_batch_row(s_pad, d, h, in_itemsize, compute_itemsize, out_lanes):
    """Approximate VMEM bytes needed per batch row (lane dims pad to 128)."""
    lane = lambda n: _round_up(max(int(n), 1), 128)
    b = 0
    b += 2 * s_pad * lane(d) * in_itemsize       # contex block, double-buffered DMA
    b += 2 * lane(d) * in_itemsize               # x block
    b += 2 * lane(s_pad) * 4                     # int32 mask block
    b += s_pad * lane(h) * 4                     # ctx (f32), live until hid reduce
    b += s_pad * lane(h) * compute_itemsize      # tanh intermediate
    b += 4 * lane(s_pad) * 4                     # att / exp / alpha temporaries
    b += 2 * lane(h) * 4                         # inp / hid
    b += 2 * out_lanes * 4                       # packed f32 output, double-buffered
    return b


def _choose_block_b(b_pad, per_row_bytes, vmem_budget, n_cores):
    """Largest batch block (multiple of 8, divisor of b_pad) fitting the VMEM
    budget; on 2-TC chips prefer an even step count for balanced megacore work."""
    avail = max(vmem_budget - (1 << 20), 1 << 20)   # ~1 MiB headroom for weights/misc
    tb_max = max(8, avail // max(per_row_bytes, 1))
    cands = [d for d in range(8, b_pad + 1, 8) if b_pad % d == 0]
    fitting = [d for d in cands if d <= tb_max]
    if not fitting:
        return 8
    if n_cores > 1:
        balanced = [d for d in fitting if (b_pad // d) % n_cores == 0]
        if balanced:
            return max(balanced)
    return max(fitting)


def _attention_math(x_ref, c_ref, m_ref, w_in_ref, b_in_ref, w_ctx_ref,
                    b_ctx_ref, v_ref, compute_dtype):
    f32 = jnp.float32
    x = x_ref[...]                         # (TB, D)   native dtype -> MXU operand
    c = c_ref[...]                         # (TB*S, D) native dtype -> MXU operand
    m = m_ref[...]                         # (TB, S)   int32, nonzero == masked
    w_in = w_in_ref[...]                   # (H, D)    native dtype
    w_ctx = w_ctx_ref[...]                 # (H, D)    native dtype
    b_in = b_in_ref[...].astype(f32)       # (1, H)
    b_ctx = b_ctx_ref[...].astype(f32)     # (1, H)
    v = v_ref[...].astype(compute_dtype)   # (1, H)

    tb, s = m.shape
    h = w_in.shape[0]

    # inp = Linear(x): (TB, D) x (D, H) matmul, f32 accumulation.
    inp = jax.lax.dot_general(x, w_in, (((1,), (1,)), ((), ())),
                              preferred_element_type=f32) + b_in            # (TB, H)

    # ctx = Conv1d(kernel_size=1): one (TB*S, D) x (D, H) MXU matmul.
    ctx2 = jax.lax.dot_general(c, w_ctx, (((1,), (1,)), ((), ())),
                               preferred_element_type=f32) + b_ctx          # (TB*S, H)
    ctx = ctx2.reshape(tb, s, h)           # layout-preserving: S padded to 8n

    # att[b,s] = sum_h V[h] * tanh(inp + ctx); add in f32, tanh + V-multiply in
    # compute_dtype (bf16 on v6e/v7x with bf16 inputs), reduce in f32.
    t = jnp.tanh((ctx + inp[:, None, :]).astype(compute_dtype))             # (TB, S, H)
    att = jnp.sum((t * v[None, :, :]).astype(f32), axis=-1)                 # (TB, S)

    # att[mask] = -inf, softmax over S (f32).  Reciprocal on the EUP path.
    att = jnp.where(m != 0, -jnp.inf, att)
    att_max = jnp.max(att, axis=-1, keepdims=True)
    e = jnp.exp(att - att_max)
    denom = jnp.sum(e, axis=-1, keepdims=True)
    alpha = e * pl.reciprocal(denom, approx=(compute_dtype != jnp.float32))  # (TB, S)

    # hidden[b,h] = sum_s ctx[b,s,h] * alpha[b,s]; products may be bf16 on
    # bf16-VPU chips, accumulation stays f32.
    hid = jnp.sum((ctx.astype(compute_dtype)
                   * alpha[:, :, None].astype(compute_dtype)).astype(f32), axis=1)
    return hid, alpha


def _attention_kernel_packed(x_ref, c_ref, m_ref, w_in_ref, b_in_ref, w_ctx_ref,
                             b_ctx_ref, v_ref, out_ref, *, compute_dtype):
    hid, alpha = _attention_math(x_ref, c_ref, m_ref, w_in_ref, b_in_ref,
                                 w_ctx_ref, b_ctx_ref, v_ref, compute_dtype)
    tb, s = alpha.shape
    h = hid.shape[-1]
    lout = out_ref.shape[-1]
    pieces = [alpha.astype(out_ref.dtype), hid.astype(out_ref.dtype)]
    if lout > s + h:
        pieces.append(jnp.zeros((tb, lout - s - h), out_ref.dtype))
    # Single lane-dense (TB, round_up(S+H,128)) store instead of two masked
    # sub-128-lane stores.
    out_ref[...] = jnp.concatenate(pieces, axis=-1)


def _attention_kernel_split(x_ref, c_ref, m_ref, w_in_ref, b_in_ref, w_ctx_ref,
                            b_ctx_ref, v_ref, hid_ref, alpha_ref, *, compute_dtype):
    hid, alpha = _attention_math(x_ref, c_ref, m_ref, w_in_ref, b_in_ref,
                                 w_ctx_ref, b_ctx_ref, v_ref, compute_dtype)
    hid_ref[...] = hid.astype(hid_ref.dtype)
    alpha_ref[...] = alpha.astype(alpha_ref.dtype)


def attention_forward(x, contex, mask, params):
    B, S, D = contex.shape
    H = params["w_in"].shape[0]

    cfg = _GEN_CONFIG[_tpu_generation()]
    in_dtype = contex.dtype
    compute_dtype = (jnp.bfloat16
                     if (cfg["bf16_vpu"] and in_dtype == jnp.bfloat16)
                     else jnp.float32)

    # Weights feed the MXU in the activation dtype; biases / V stay f32.
    w_in = params["w_in"].astype(in_dtype)
    w_ctx = params["w_ctx"].astype(in_dtype)               # Conv1d (H, D, 1) squeezed
    b_in = params["b_in"].reshape(1, H).astype(jnp.float32)
    b_ctx = params["b_ctx"].reshape(1, H).astype(jnp.float32)
    v = params["v"].reshape(1, H).astype(jnp.float32)

    x = x.astype(in_dtype)
    mask_i = mask.astype(jnp.int32)

    # Pad S to a multiple of 8 (pad positions masked) so the in-kernel
    # (TB*S,H)->(TB,S,H) reshape is layout-preserving; pad B to a multiple of 8
    # for legal sublane block sizes (padded rows sliced off afterwards).
    S_pad = _round_up(S, 8)
    B_pad = _round_up(max(B, 1), 8)
    if S_pad != S:
        contex = jnp.pad(contex, ((0, 0), (0, S_pad - S), (0, 0)))
        mask_i = jnp.pad(mask_i, ((0, 0), (0, S_pad - S)), constant_values=1)
    if B_pad != B:
        pad = B_pad - B
        x = jnp.pad(x, ((0, pad), (0, 0)))
        contex = jnp.pad(contex, ((0, pad), (0, 0), (0, 0)))
        mask_i = jnp.pad(mask_i, ((0, pad), (0, 0)))

    # Flatten contex in the wrapper (free XLA reshape) so the kernel never
    # reshapes the raw input block.
    contex_flat = contex.reshape(B_pad * S_pad, D)

    LOUT = _round_up(S_pad + H, 128)
    per_row = _bytes_per_batch_row(S_pad, D, H,
                                   jnp.dtype(in_dtype).itemsize,
                                   jnp.dtype(compute_dtype).itemsize, LOUT)
    TB = _choose_block_b(B_pad, per_row, cfg["vmem_budget"], cfg["n_cores"])
    grid = (B_pad // TB,)

    cp_kwargs = dict(dimension_semantics=("parallel",))
    if cfg["vmem_limit"] is not None:
        cp_kwargs["vmem_limit_bytes"] = cfg["vmem_limit"]
    compiler_params = pltpu.CompilerParams(**cp_kwargs)

    in_specs = [
        pl.BlockSpec((TB, D), lambda b: (b, 0)),            # x block
        pl.BlockSpec((TB * S_pad, D), lambda b: (b, 0)),    # contex block (flat, native dtype)
        pl.BlockSpec((TB, S_pad), lambda b: (b, 0)),        # mask block
        pl.BlockSpec((H, D), lambda b: (0, 0)),             # W_in (resident)
        pl.BlockSpec((1, H), lambda b: (0, 0)),             # b_in
        pl.BlockSpec((H, D), lambda b: (0, 0)),             # W_ctx
        pl.BlockSpec((1, H), lambda b: (0, 0)),             # b_ctx
        pl.BlockSpec((1, H), lambda b: (0, 0)),             # V
    ]
    args = (x, contex_flat, mask_i, w_in, b_in, w_ctx, b_ctx, v)

    try:
        out = pl.pallas_call(
            functools.partial(_attention_kernel_packed, compute_dtype=compute_dtype),
            out_shape=jax.ShapeDtypeStruct((B_pad, LOUT), jnp.float32),
            grid=grid,
            in_specs=in_specs,
            out_specs=pl.BlockSpec((TB, LOUT), lambda b: (b, 0)),
            compiler_params=compiler_params,
        )(*args)
        out = jax.block_until_ready(out)    # surface compile/runtime errors here
        alpha = out[:B, :S]
        hid = out[:B, S_pad:S_pad + H]
        return hid, alpha
    except Exception:
        # TODO(synk): fallback if lane-dim concatenation is rejected by this
        # jaxlib's Mosaic lowering; uses two narrow (masked-store) outputs.
        hid, alpha = pl.pallas_call(
            functools.partial(_attention_kernel_split, compute_dtype=compute_dtype),
            out_shape=(jax.ShapeDtypeStruct((B_pad, H), jnp.float32),
                       jax.ShapeDtypeStruct((B_pad, S_pad), jnp.float32)),
            grid=grid,
            in_specs=in_specs,
            out_specs=(pl.BlockSpec((TB, H), lambda b: (b, 0)),
                       pl.BlockSpec((TB, S_pad), lambda b: (b, 0))),
            compiler_params=compiler_params,
        )(*args)
        return hid[:B], alpha[:B, :S]


def attention_reference(x, contex, mask, params):
    """Pure-JAX mirror of the PyTorch forward, for verification."""
    w_in, b_in = params["w_in"], params["b_in"]
    w_ctx, b_ctx = params["w_ctx"], params["b_ctx"]
    v = params["v"]
    inp = x @ w_in.T + b_in                                                   # (B, H)
    ctx = jnp.einsum('bsd,hd->bhs', contex, w_ctx) + b_ctx[None, :, None]     # (B, H, S)
    t = jnp.tanh(inp[:, :, None] + ctx)                                       # (B, H, S)
    att = jnp.einsum('h,bhs->bs', v, t)                                       # (B, S)
    att = jnp.where(mask, -jnp.inf, att)
    alpha = jax.nn.softmax(att, axis=1)
    hidden = jnp.einsum('bhs,bs->bh', ctx, alpha)
    return hidden, alpha


if __name__ == "__main__":
    B, S, D, H = 2, 8, 4, 32   # batch, seq_len, input_dim, hidden_dim

    key = jax.random.PRNGKey(0)
    k1, k2, k3, k4, k5, kx, kc = jax.random.split(key, 7)
    bound = 1.0 / np.sqrt(D)
    params = {
        "w_in":  jax.random.uniform(k1, (H, D), jnp.float32, -bound, bound),
        "b_in":  jax.random.uniform(k2, (H,),   jnp.float32, -bound, bound),
        "w_ctx": jax.random.uniform(k3, (H, D), jnp.float32, -bound, bound),  # Conv1d (H, D, 1) squeezed
        "b_ctx": jax.random.uniform(k4, (H,),   jnp.float32, -bound, bound),
        "v":     jax.random.uniform(k5, (H,),   jnp.float32, -1.0, 1.0),      # nn.init.uniform_(-1, 1)
    }

    x = jax.random.normal(kx, (B, D), jnp.float32)
    contex = jax.random.normal(kc, (B, S, D), jnp.float32)
    mask = jnp.zeros((B, S), dtype=bool).at[0, 1].set(True).at[1, 3].set(True).at[1, 5].set(True)

    hidden, alpha = attention_forward(x, contex, mask, params)
    hidden = jax.block_until_ready(hidden)
    alpha = jax.block_until_ready(alpha)

    hidden_ref, alpha_ref = attention_reference(x, contex, mask, params)
    np.testing.assert_allclose(np.asarray(alpha), np.asarray(alpha_ref), rtol=1e-5, atol=1e-5)
    np.testing.assert_allclose(np.asarray(hidden), np.asarray(hidden_ref), rtol=1e-5, atol=1e-5)
    assert np.allclose(np.asarray(alpha)[np.asarray(mask)], 0.0)  # masked positions get zero attention

    # TODO(synk): fully-masked rows produce NaN alpha (matches torch softmax of all -inf).
    print("KERNEL_OK")
</pallas_src>

<mosaic_0001>
module attributes {stable_mosaic.version = 11 : i64} {
  func.func @_attention_kernel_packed(%arg0: i32, %arg1: memref<8x4xf32, #tpu.memory_space<vmem>>, %arg2: memref<64x4xf32, #tpu.memory_space<vmem>>, %arg3: memref<8x8xi32, #tpu.memory_space<vmem>>, %arg4: memref<32x4xf32, #tpu.memory_space<vmem>>, %arg5: memref<1x32xf32, #tpu.memory_space<vmem>>, %arg6: memref<32x4xf32, #tpu.memory_space<vmem>>, %arg7: memref<1x32xf32, #tpu.memory_space<vmem>>, %arg8: memref<1x32xf32, #tpu.memory_space<vmem>>, %arg9: memref<8x128xf32, #tpu.memory_space<vmem>>) attributes {dimension_semantics = [#tpu.dimension_semantics<parallel>], iteration_bounds = array<i64: 1>, scalar_prefetch = 0 : i64, scratch_operands = 0 : i64, tpu.core_type = #tpu.core_type<tc>, window_params = [{transform_indices = @transform_0, window_bounds = array<i64: 8, 4>}, {transform_indices = @transform_1, window_bounds = array<i64: 64, 4>}, {transform_indices = @transform_2, window_bounds = array<i64: 8, 8>}, {pipeline_mode = #tpu.pipeline_mode<synchronous>, transform_indices = @transform_3, window_bounds = array<i64: 32, 4>}, {pipeline_mode = #tpu.pipeline_mode<synchronous>, transform_indices = @transform_4, window_bounds = array<i64: 1, 32>}, {pipeline_mode = #tpu.pipeline_mode<synchronous>, transform_indices = @transform_5, window_bounds = array<i64: 32, 4>}, {pipeline_mode = #tpu.pipeline_mode<synchronous>, transform_indices = @transform_6, window_bounds = array<i64: 1, 32>}, {pipeline_mode = #tpu.pipeline_mode<synchronous>, transform_indices = @transform_7, window_bounds = array<i64: 1, 32>}, {transform_indices = @transform_8, window_bounds = array<i64: 8, 128>}]} {
    %c0 = arith.constant 0 : index
    %c0_0 = arith.constant 0 : index
    %0 = vector.load %arg1[%c0, %c0_0] : memref<8x4xf32, #tpu.memory_space<vmem>>, vector<8x4xf32>
    %c0_1 = arith.constant 0 : index
    %c0_2 = arith.constant 0 : index
    %1 = vector.load %arg2[%c0_1, %c0_2] : memref<64x4xf32, #tpu.memory_space<vmem>>, vector<64x4xf32>
    %c0_3 = arith.constant 0 : index
    %c0_4 = arith.constant 0 : index
    %2 = vector.load %arg3[%c0_3, %c0_4] : memref<8x8xi32, #tpu.memory_space<vmem>>, vector<8x8xi32>
    %c0_5 = arith.constant 0 : index
    %c0_6 = arith.constant 0 : index
    %3 = vector.load %arg4[%c0_5, %c0_6] : memref<32x4xf32, #tpu.memory_space<vmem>>, vector<32x4xf32>
    %c0_7 = arith.constant 0 : index
    %c0_8 = arith.constant 0 : index
    %4 = vector.load %arg6[%c0_7, %c0_8] : memref<32x4xf32, #tpu.memory_space<vmem>>, vector<32x4xf32>
    %c0_9 = arith.constant 0 : index
    %c0_10 = arith.constant 0 : index
    %5 = vector.load %arg5[%c0_9, %c0_10] : memref<1x32xf32, #tpu.memory_space<vmem>>, vector<1x32xf32>
    %c0_11 = arith.constant 0 : index
    %c0_12 = arith.constant 0 : index
    %6 = vector.load %arg7[%c0_11, %c0_12] : memref<1x32xf32, #tpu.memory_space<vmem>>, vector<1x32xf32>
    %c0_13 = arith.constant 0 : index
    %c0_14 = arith.constant 0 : index
    %7 = vector.load %arg8[%c0_13, %c0_14] : memref<1x32xf32, #tpu.memory_space<vmem>>, vector<1x32xf32>
    %cst = arith.constant dense<0.000000e+00> : vector<8x32xf32>
    %8 = tpu.matmul %0, %3, %cst {dimension_numbers = #tpu.dot_dimension_numbers<[1], [1], [0], [0], [0, 0, 1, 0], [], []>} : vector<8x4xf32>, vector<32x4xf32>, vector<8x32xf32> -> vector<8x32xf32>
    %9 = vector.broadcast %5 : vector<1x32xf32> to vector<8x32xf32>
    %10 = arith.addf %8, %9 : vector<8x32xf32>
    %cst_15 = arith.constant dense<0.000000e+00> : vector<64x32xf32>
    %11 = tpu.matmul %1, %4, %cst_15 {dimension_numbers = #tpu.dot_dimension_numbers<[1], [1], [0], [0], [0, 0, 1, 0], [], []>} : vector<64x4xf32>, vector<32x4xf32>, vector<64x32xf32> -> vector<64x32xf32>
    %12 = vector.broadcast %6 : vector<1x32xf32> to vector<64x32xf32>
    %13 = arith.addf %11, %12 : vector<64x32xf32>
    %14 = vector.shape_cast %13 : vector<64x32xf32> to vector<8x8x32xf32>
    %15 = vector.shape_cast %10 : vector<8x32xf32> to vector<8x1x32xf32>
    %16 = vector.broadcast %15 : vector<8x1x32xf32> to vector<8x8x32xf32>
    %17 = arith.addf %14, %16 : vector<8x8x32xf32>
    %18 = math.tanh %17 : vector<8x8x32xf32>
    %19 = vector.shape_cast %7 : vector<1x32xf32> to vector<1x1x32xf32>
    %20 = vector.broadcast %19 : vector<1x1x32xf32> to vector<8x8x32xf32>
    %21 = arith.mulf %18, %20 : vector<8x8x32xf32>
    %cst_16 = arith.constant dense<0.000000e+00> : vector<8x8xf32>
    %22 = vector.multi_reduction <add>, %21, %cst_16 [2] : vector<8x8x32xf32> to vector<8x8xf32>
    %c0_i32 = arith.constant 0 : i32
    %23 = vector.broadcast %c0_i32 : i32 to vector<8x8xi32>
    %24 = arith.cmpi ne, %2, %23 : vector<8x8xi32>
    %cst_17 = arith.constant 0xFF800000 : f32
    %25 = vector.broadcast %cst_17 : f32 to vector<8x8xf32>
    %26 = arith.select %24, %25, %22 : vector<8x8xi1>, vector<8x8xf32>
    %cst_18 = arith.constant dense<0xFF800000> : vector<8xf32>
    %27 = vector.multi_reduction <maximumf>, %26, %cst_18 [1] : vector<8x8xf32> to vector<8xf32>
    %28 = vector.shape_cast %27 : vector<8xf32> to vector<8x1xf32>
    %29 = vector.broadcast %28 : vector<8x1xf32> to vector<8x8xf32>
    %30 = arith.subf %26, %29 : vector<8x8xf32>
    %31 = math.exp %30 : vector<8x8xf32>
    %cst_19 = arith.constant dense<0.000000e+00> : vector<8xf32>
    %32 = vector.multi_reduction <add>, %31, %cst_19 [1] : vector<8x8xf32> to vector<8xf32>
    %33 = vector.shape_cast %32 : vector<8xf32> to vector<8x1xf32>
    %34 = tpu.reciprocal %33 : vector<8x1xf32> -> vector<8x1xf32>
    %35 = vector.broadcast %34 : vector<8x1xf32> to vector<8x8xf32>
    %36 = arith.mulf %31, %35 : vector<8x8xf32>
    %37 = vector.shape_cast %36 : vector<8x8xf32> to vector<8x8x1xf32>
    %38 = vector.broadcast %37 : vector<8x8x1xf32> to vector<8x8x32xf32>
    %39 = arith.mulf %14, %38 : vector<8x8x32xf32>
    %cst_20 = arith.constant dense<0.000000e+00> : vector<8x32xf32>
    %40 = vector.multi_reduction <add>, %39, %cst_20 [1] : vector<8x8x32xf32> to vector<8x32xf32>
    %cst_21 = arith.constant 0.000000e+00 : f32
    %41 = vector.broadcast %cst_21 : f32 to vector<8x88xf32>
    %42 = tpu.concatenate %36, %40, %41 in 1 : vector<8x8xf32>, vector<8x32xf32>, vector<8x88xf32> -> vector<8x128xf32>
    %c0_22 = arith.constant 0 : index
    %c0_23 = arith.constant 0 : index
    %43 = vector.load %arg9[%c0_22, %c0_23] : memref<8x128xf32, #tpu.memory_space<vmem>>, vector<8x128xf32>
    tpu.vector_store %arg9[%c0_22, %c0_23], %42 {strides = array<i32>} : memref<8x128xf32, #tpu.memory_space<vmem>>, vector<8x128xf32>,
    return
  }
  func.func @transform_0(%arg0: i32) -> (i32, i32) {
    %c0_i32 = arith.constant 0 : i32
    %c0_i32_0 = arith.constant 0 : i32
    return %arg0, %c0_i32 : i32, i32
  }
  func.func @transform_1(%arg0: i32) -> (i32, i32) {
    %c0_i32 = arith.constant 0 : i32
    %c0_i32_0 = arith.constant 0 : i32
    return %arg0, %c0_i32 : i32, i32
  }
  func.func @transform_2(%arg0: i32) -> (i32, i32) {
    %c0_i32 = arith.constant 0 : i32
    %c0_i32_0 = arith.constant 0 : i32
    return %arg0, %c0_i32 : i32, i32
  }
  func.func @transform_3(%arg0: i32) -> (i32, i32) {
    %c0_i32 = arith.constant 0 : i32
    %c0_i32_0 = arith.constant 0 : i32
    %c0_i32_1 = arith.constant 0 : i32
    return %c0_i32, %c0_i32_0 : i32, i32
  }
  func.func @transform_4(%arg0: i32) -> (i32, i32) {
    %c0_i32 = arith.constant 0 : i32
    %c0_i32_0 = arith.constant 0 : i32
    %c0_i32_1 = arith.constant 0 : i32
    return %c0_i32, %c0_i32_0 : i32, i32
  }
  func.func @transform_5(%arg0: i32) -> (i32, i32) {
    %c0_i32 = arith.constant 0 : i32
    %c0_i32_0 = arith.constant 0 : i32
    %c0_i32_1 = arith.constant 0 : i32
    return %c0_i32, %c0_i32_0 : i32, i32
  }
  func.func @transform_6(%arg0: i32) -> (i32, i32) {
    %c0_i32 = arith.constant 0 : i32
    %c0_i32_0 = arith.constant 0 : i32
    %c0_i32_1 = arith.constant 0 : i32
    return %c0_i32, %c0_i32_0 : i32, i32
  }
  func.func @transform_7(%arg0: i32) -> (i32, i32) {
    %c0_i32 = arith.constant 0 : i32
    %c0_i32_0 = arith.constant 0 : i32
    %c0_i32_1 = arith.constant 0 : i32
    return %c0_i32, %c0_i32_0 : i32, i32
  }
  func.func @transform_8(%arg0: i32) -> (i32, i32) {
    %c0_i32 = arith.constant 0 : i32
    %c0_i32_0 = arith.constant 0 : i32
    return %arg0, %c0_i32 : i32, i32
  }
}

module attributes {stable_mosaic.version = 11 : i64} {
  func.func @_attention_kernel_split(%arg0: i32, %arg1: memref<8x4xf32, #tpu.memory_space<vmem>>, %arg2: memref<64x4xf32, #tpu.memory_space<vmem>>, %arg3: memref<8x8xi32, #tpu.memory_space<vmem>>, %arg4: memref<32x4xf32, #tpu.memory_space<vmem>>, %arg5: memref<1x32xf32, #tpu.memory_space<vmem>>, %arg6: memref<32x4xf32, #tpu.memory_space<vmem>>, %arg7: memref<1x32xf32, #tpu.memory_space<vmem>>, %arg8: memref<1x32xf32, #tpu.memory_space<vmem>>, %arg9: memref<8x32xf32, #tpu.memory_space<vmem>>, %arg10: memref<8x8xf32, #tpu.memory_space<vmem>>) attributes {dimension_semantics = [#tpu.dimension_semantics<parallel>], iteration_bounds = array<i64: 1>, scalar_prefetch = 0 : i64, scratch_operands = 0 : i64, tpu.core_type = #tpu.core_type<tc>, window_params = [{transform_indices = @transform_0, window_bounds = array<i64: 8, 4>}, {transform_indices = @transform_1, window_bounds = array<i64: 64, 4>}, {transform_indices = @transform_2, window_bounds = array<i64: 8, 8>}, {pipeline_mode = #tpu.pipeline_mode<synchronous>, transform_indices = @transform_3, window_bounds = array<i64: 32, 4>}, {pipeline_mode = #tpu.pipeline_mode<synchronous>, transform_indices = @transform_4, window_bounds = array<i64: 1, 32>}, {pipeline_mode = #tpu.pipeline_mode<synchronous>, transform_indices = @transform_5, window_bounds = array<i64: 32, 4>}, {pipeline_mode = #tpu.pipeline_mode<synchronous>, transform_indices = @transform_6, window_bounds = array<i64: 1, 32>}, {pipeline_mode = #tpu.pipeline_mode<synchronous>, transform_indices = @transform_7, window_bounds = array<i64: 1, 32>}, {transform_indices = @transform_8, window_bounds = array<i64: 8, 32>}, {transform_indices = @transform_9, window_bounds = array<i64: 8, 8>}]} {
    %c0 = arith.constant 0 : index
    %c0_0 = arith.constant 0 : index
    %0 = vector.load %arg1[%c0, %c0_0] : memref<8x4xf32, #tpu.memory_space<vmem>>, vector<8x4xf32>
    %c0_1 = arith.constant 0 : index
    %c0_2 = arith.constant 0 : index
    %1 = vector.load %arg2[%c0_1, %c0_2] : memref<64x4xf32, #tpu.memory_space<vmem>>, vector<64x4xf32>
    %c0_3 = arith.constant 0 : index
    %c0_4 = arith.constant 0 : index
    %2 = vector.load %arg3[%c0_3, %c0_4] : memref<8x8xi32, #tpu.memory_space<vmem>>, vector<8x8xi32>
    %c0_5 = arith.constant 0 : index
    %c0_6 = arith.constant 0 : index
    %3 = vector.load %arg4[%c0_5, %c0_6] : memref<32x4xf32, #tpu.memory_space<vmem>>, vector<32x4xf32>
    %c0_7 = arith.constant 0 : index
    %c0_8 = arith.constant 0 : index
    %4 = vector.load %arg6[%c0_7, %c0_8] : memref<32x4xf32, #tpu.memory_space<vmem>>, vector<32x4xf32>
    %c0_9 = arith.constant 0 : index
    %c0_10 = arith.constant 0 : index
    %5 = vector.load %arg5[%c0_9, %c0_10] : memref<1x32xf32, #tpu.memory_space<vmem>>, vector<1x32xf32>
    %c0_11 = arith.constant 0 : index
    %c0_12 = arith.constant 0 : index
    %6 = vector.load %arg7[%c0_11, %c0_12] : memref<1x32xf32, #tpu.memory_space<vmem>>, vector<1x32xf32>
    %c0_13 = arith.constant 0 : index
    %c0_14 = arith.constant 0 : index
    %7 = vector.load %arg8[%c0_13, %c0_14] : memref<1x32xf32, #tpu.memory_space<vmem>>, vector<1x32xf32>
    %cst = arith.constant dense<0.000000e+00> : vector<8x32xf32>
    %8 = tpu.matmul %0, %3, %cst {dimension_numbers = #tpu.dot_dimension_numbers<[1], [1], [0], [0], [0, 0, 1, 0], [], []>} : vector<8x4xf32>, vector<32x4xf32>, vector<8x32xf32> -> vector<8x32xf32>
    %9 = vector.broadcast %5 : vector<1x32xf32> to vector<8x32xf32>
    %10 = arith.addf %8, %9 : vector<8x32xf32>
    %cst_15 = arith.constant dense<0.000000e+00> : vector<64x32xf32>
    %11 = tpu.matmul %1, %4, %cst_15 {dimension_numbers = #tpu.dot_dimension_numbers<[1], [1], [0], [0], [0, 0, 1, 0], [], []>} : vector<64x4xf32>, vector<32x4xf32>, vector<64x32xf32> -> vector<64x32xf32>
    %12 = vector.broadcast %6 : vector<1x32xf32> to vector<64x32xf32>
    %13 = arith.addf %11, %12 : vector<64x32xf32>
    %14 = vector.shape_cast %13 : vector<64x32xf32> to vector<8x8x32xf32>
    %15 = vector.shape_cast %10 : vector<8x32xf32> to vector<8x1x32xf32>
    %16 = vector.broadcast %15 : vector<8x1x32xf32> to vector<8x8x32xf32>
    %17 = arith.addf %14, %16 : vector<8x8x32xf32>
    %18 = math.tanh %17 : vector<8x8x32xf32>
    %19 = vector.shape_cast %7 : vector<1x32xf32> to vector<1x1x32xf32>
    %20 = vector.broadcast %19 : vector<1x1x32xf32> to vector<8x8x32xf32>
    %21 = arith.mulf %18, %20 : vector<8x8x32xf32>
    %cst_16 = arith.constant dense<0.000000e+00> : vector<8x8xf32>
    %22 = vector.multi_reduction <add>, %21, %cst_16 [2] : vector<8x8x32xf32> to vector<8x8xf32>
    %c0_i32 = arith.constant 0 : i32
    %23 = vector.broadcast %c0_i32 : i32 to vector<8x8xi32>
    %24 = arith.cmpi ne, %2, %23 : vector<8x8xi32>
    %cst_17 = arith.constant 0xFF800000 : f32
    %25 = vector.broadcast %cst_17 : f32 to vector<8x8xf32>
    %26 = arith.select %24, %25, %22 : vector<8x8xi1>, vector<8x8xf32>
    %cst_18 = arith.constant dense<0xFF800000> : vector<8xf32>
    %27 = vector.multi_reduction <maximumf>, %26, %cst_18 [1] : vector<8x8xf32> to vector<8xf32>
    %28 = vector.shape_cast %27 : vector<8xf32> to vector<8x1xf32>
    %29 = vector.broadcast %28 : vector<8x1xf32> to vector<8x8xf32>
    %30 = arith.subf %26, %29 : vector<8x8xf32>
    %31 = math.exp %30 : vector<8x8xf32>
    %cst_19 = arith.constant dense<0.000000e+00> : vector<8xf32>
    %32 = vector.multi_reduction <add>, %31, %cst_19 [1] : vector<8x8xf32> to vector<8xf32>
    %33 = vector.shape_cast %32 : vector<8xf32> to vector<8x1xf32>
    %34 = tpu.reciprocal %33 : vector<8x1xf32> -> vector<8x1xf32>
    %35 = vector.broadcast %34 : vector<8x1xf32> to vector<8x8xf32>
    %36 = arith.mulf %31, %35 : vector<8x8xf32>
    %37 = vector.shape_cast %36 : vector<8x8xf32> to vector<8x8x1xf32>
    %38 = vector.broadcast %37 : vector<8x8x1xf32> to vector<8x8x32xf32>
    %39 = arith.mulf %14, %38 : vector<8x8x32xf32>
    %cst_20 = arith.constant dense<0.000000e+00> : vector<8x32xf32>
    %40 = vector.multi_reduction <add>, %39, %cst_20 [1] : vector<8x8x32xf32> to vector<8x32xf32>
    %c0_21 = arith.constant 0 : index
    %c0_22 = arith.constant 0 : index
    %41 = vector.load %arg9[%c0_21, %c0_22] : memref<8x32xf32, #tpu.memory_space<vmem>>, vector<8x32xf32>
    tpu.vector_store %arg9[%c0_21, %c0_22], %40 {strides = array<i32>} : memref<8x32xf32, #tpu.memory_space<vmem>>, vector<8x32xf32>,
    %c0_23 = arith.constant 0 : index
    %c0_24 = arith.constant 0 : index
    %42 = vector.load %arg10[%c0_23, %c0_24] : memref<8x8xf32, #tpu.memory_space<vmem>>, vector<8x8xf32>
    tpu.vector_store %arg10[%c0_23, %c0_24], %36 {strides = array<i32>} : memref<8x8xf32, #tpu.memory_space<vmem>>, vector<8x8xf32>,
    return
  }
  func.func @transform_0(%arg0: i32) -> (i32, i32) {
    %c0_i32 = arith.constant 0 : i32
    %c0_i32_0 = arith.constant 0 : i32
    return %arg0, %c0_i32 : i32, i32
  }
  func.func @transform_1(%arg0: i32) -> (i32, i32) {
    %c0_i32 = arith.constant 0 : i32
    %c0_i32_0 = arith.constant 0 : i32
    return %arg0, %c0_i32 : i32, i32
  }
  func.func @transform_2(%arg0: i32) -> (i32, i32) {
    %c0_i32 = arith.constant 0 : i32
    %c0_i32_0 = arith.constant 0 : i32
    return %arg0, %c0_i32 : i32, i32
  }
  func.func @transform_3(%arg0: i32) -> (i32, i32) {
    %c0_i32 = arith.constant 0 : i32
    %c0_i32_0 = arith.constant 0 : i32
    %c0_i32_1 = arith.constant 0 : i32
    return %c0_i32, %c0_i32_0 : i32, i32
  }
  func.func @transform_4(%arg0: i32) -> (i32, i32) {
    %c0_i32 = arith.constant 0 : i32
    %c0_i32_0 = arith.constant 0 : i32
    %c0_i32_1 = arith.constant 0 : i32
    return %c0_i32, %c0_i32_0 : i32, i32
  }
  func.func @transform_5(%arg0: i32) -> (i32, i32) {
    %c0_i32 = arith.constant 0 : i32
    %c0_i32_0 = arith.constant 0 : i32
    %c0_i32_1 = arith.constant 0 : i32
    return %c0_i32, %c0_i32_0 : i32, i32
  }
  func.func @transform_6(%arg0: i32) -> (i32, i32) {
    %c0_i32 = arith.constant 0 : i32
    %c0_i32_0 = arith.constant 0 : i32
    %c0_i32_1 = arith.constant 0 : i32
    return %c0_i32, %c0_i32_0 : i32, i32
  }
  func.func @transform_7(%arg0: i32) -> (i32, i32) {
    %c0_i32 = arith.constant 0 : i32
    %c0_i32_0 = arith.constant 0 : i32
    %c0_i32_1 = arith.constant 0 : i32
    return %c0_i32, %c0_i32_0 : i32, i32
  }
  func.func @transform_8(%arg0: i32) -> (i32, i32) {
    %c0_i32 = arith.constant 0 : i32
    %c0_i32_0 = arith.constant 0 : i32
    return %arg0, %c0_i32 : i32, i32
  }
  func.func @transform_9(%arg0: i32) -> (i32, i32) {
    %c0_i32 = arith.constant 0 : i32
    %c0_i32_0 = arith.constant 0 : i32
    return %arg0, %c0_i32 : i32, i32
  }
}

</mosaic_0001>

<bundles_post_ra>
// kernel: tpu_custom_call.1
= control target key start
LH: loop header
LB: loop body
LE: loop exit
PB: predicated region body
PF: predicated region fallthrough
CT: control target
= control target key end

     0   :  { %vm57_vm0 = vcmask 31744   ;;  %v800_v3 = vmov 0.0|0.0   ;;  %vm801_vm2 = vmmov 0   ;;  %v802_v10 = vmov 0.0   ;;  %s1054_s0 = inlined_call_operand.vmem [shape: f32[8,4], index: 0, kind: input, shape index: {}]   ;;  %s1055_s1 = inlined_call_operand.vmem [shape: f32[64,4], index: 1, kind: input, shape index: {}]   ;;  %s1056_s2 = inlined_call_operand.vmem [shape: s32[8,8], index: 2, kind: input, shape index: {}]   ;;  %s1057_s3 = inlined_call_operand.vmem [shape: f32[32,4], index: 3, kind: input, shape index: {}]   ;;  %s1058_s4 = inlined_call_operand.vmem [shape: f32[1,32], index: 4, kind: input, shape index: {}]   ;;  %s1059_s5 = inlined_call_operand.vmem [shape: f32[32,4], index: 5, kind: input, shape index: {}]   ;;  %s1060_s6 = inlined_call_operand.vmem [shape: f32[1,32], index: 6, kind: input, shape index: {}]   ;;  %s1061_s7 = inlined_call_operand.vmem [shape: f32[1,32], index: 7, kind: input, shape index: {}]   ;;  %s1062_s8 = inlined_call_operand.hbm [shape: f32[8,128], index: 8, kind: output, shape index: {}]  }
   0x1   :  { %v40_v0 = vld [vmem:[%s1057_s3] sm:$0xff]  ;;  %v41_v1 = vld [vmem:[%s1057_s3 + $0x8] sm:$0xff]  ;;  %730 = vmatprep.subr.bf16.mxu0 %v800_v3  ;;  %vm862_vm1 = vmpackc.low %vm57_vm0, %vm57_vm0  ;;  %707 = vmatprep.mubr.msk.f32.mxu0 %vm801_vm2, %v802_v10 }
   0x2   :  { %v44_v2 = vld [vmem:[%s1059_s5] sm:$0xff]  ;;  %v731_v4 = vpack.c.bf16 %v41_v1, %v40_v0  ;;  %v45_v6 = vld [vmem:[%s1059_s5 + $0x8] sm:$0xff]  ;;  %v46_v8 = vld [vmem:[%s1059_s5 + $0x10] sm:$0xff] }
   0x3   :  { %v738_v7 = vpack.c.bf16 %v45_v6, %v44_v2  ;;  %v47_v9 = vld [vmem:[%s1059_s5 + $0x18] sm:$0xff]  ;;  %v31_v12 = vld [vmem:[%s1055_s1] sm:$0xff]  ;;  %v42_v13 = vld [vmem:[%s1057_s3 + $0x10] sm:$0xff] }
   0x4   :  { %733 = vmatpush3.bf16.xpose.msk.msra.mxu0 %vm862_vm1, %v731_v4  ;;  %v744_v11 = vpack.c.bf16 %v47_v9, %v46_v8  ;;  %v43_v14 = vld [vmem:[%s1057_s3 + $0x18] sm:$0xff]  ;;  %718 = vmatprep.mubr.msk.f32.mxu1 %vm57_vm0, %v31_v12 }
   0x5   :  { %740 = vmatprep.subr.msk.bf16.mxu1 %vm862_vm1, %v738_v7  ;;  %734 = vmatprep.subr.bf16.mxu0 %v800_v3 }
   0x6   :  { %743 = vmatpush3.bf16.xpose.msk.msra.mxu1 %vm862_vm1, %v738_v7 }
   0x7   :  { %746 = vmatprep.subr.msk.bf16.mxu1 %vm862_vm1, %v744_v11 }
   0x8   :  { %13 = vsyncpa [#allocation3], 0  ;;  %v735_v15 = vpack.c.bf16 %v43_v14, %v42_v13  ;;  %v30_v16 = vld [vmem:[%s1054_s0] sm:$0xff]  ;;  %v32_v17 = vld [vmem:[%s1055_s1 + $0x8] sm:$0xff]  ;;  %v803_v24 = vmov 1966171168   ;;  %v295_v26 = vlaneseq }
   0x9   :  { %v33_v18 = vld [vmem:[%s1055_s1 + $0x10] sm:$0xff]  ;;  %v34_v19 = vld [vmem:[%s1055_s1 + $0x18] sm:$0xff]  ;;  %v35_v20 = vld [vmem:[%s1055_s1 + $0x20] sm:$0xff]  ;;  %v293_v25 = vunpack.c.l.s4 %v803_v24  ;;  %vm410_vm3 = vcmask 261120   ;;  %vm478_vm4 = vcmask 1041409   ;;  %vm480_vm5 = vcmask 1042434  }
   0xa   :  { %v36_v21 = vld [vmem:[%s1055_s1 + $0x28] sm:$0xff]  ;;  %v37_v22 = vld [vmem:[%s1055_s1 + $0x30] sm:$0xff]  ;;  %v38_v23 = vld [vmem:[%s1055_s1 + $0x38] sm:$0xff]  ;;  %v930_v28 = vshrl.u32 %v295_v26, 7  ;;  %vm482_vm6 = vcmask 1043459   ;;  %vm484_vm7 = vcmask 1044484  }
   0xb   :  { %v294_v27 = vunpack.c.0.s8 %v293_v25  ;;  %v662_v29 = vld [vmem:[%s1058_s4] ss:$0 sm:$0xff]  ;;  %vm486_vm8 = vcmask 1045509   ;;  %vm488_vm9 = vcmask 1046534   ;;  %vm490_vm10 = vcmask 1047559   ;;  %s805_s18 = smov [#allocation2]  }
   0xc   :  { %737 = vmatpush3.bf16.xpose.msk.msra.mxu0 %vm862_vm1, %v735_v15  ;;  %v937_v37 = vsub.s32 0, %v930_v28  ;;  %v668_v39 = vld [vmem:[%s1060_s6] ss:$0 sm:$0xff]  ;;  %vm494_vm12 = vcmask 64512   ;;  %s654_s19 = sshll.u32 %s805_s18, 4  ;;  %vm645_vm13 = vcmask 326656   ;;  %s655_s19 = int_to_ptr.vmem [resolvable:$true] %s654_s19 }
   0xd   :  { %v297_v30 = vsub.s32 %v294_v27, %v930_v28  ;;  %s776_s20 = scalar_lea.vmem %s655_s19, 128  ;;  %p781_p1 = scmp.lt.s32.totalorder %s655_s19, %s655_s19 }
   0xe   :  { %749 = vmatpush3.bf16.xpose.msk.msra.mxu1 %vm862_vm1, %v744_v11  ;;  %p777_p0 = scmp.ne.s32.totalorder %s655_s19, %s776_s20  ;;  %p782_p2 = scmp.lt.s32.totalorder %s776_s20, %s776_s20 }
  0x10   :  { %p783_p3 = por %p782_p2, %p781_p1 }
  0x12   :  { %p784_p4 = pnand %p783_p3, %p777_p0 }
  0x13   :  { %708 = vmatmul.mubr.msk.f32.vlgmr.msra.gmra.mrb[0].mxu0 %vm57_vm0, %v30_v16 }
  0x15   :  { %719 = vmatmul.mubr.msk.f32.vlgmr.msra.gmra.mrb[0].mxu1 %vm57_vm0, %v32_v17  ;;  %v681_v17 = vld [vmem:[%s1061_s7] ss:$0 sm:$0xff] }
  0x16   :  { %721 = vmatprep.mubr.msk.f32.mxu1 %vm57_vm0, %v33_v18 }
  0x19   :  { %722 = vmatmul.mubr.msk.f32.gmra.mrb[2].mxu1 %vm57_vm0, %v34_v19 }
  0x1a   :  { %724 = vmatprep.mubr.msk.f32.mxu1 %vm57_vm0, %v35_v20 }
  0x1d   :  { %725 = vmatmul.mubr.msk.f32.gmra.mrb[4].mxu1 %vm57_vm0, %v36_v21 }
  0x1e   :  { %727 = vmatprep.mubr.msk.f32.mxu1 %vm57_vm0, %v37_v22 }
  0x21   :  { %728 = vmatmul.mubr.msk.f32.gmra.mrb[6].mxu1 %vm57_vm0, %v38_v23 }
  0xe6   :  { %v139_v31 = vpop.f32.mrb[0].mxu0 }
  0xe7   :  { %v140_v32 = vadd.f32 %v662_v29, %v139_v31  ;;  %v709_v33 = vpop.f32.mrb[1].mxu0 }
  0xe8   :  { %v720_v34 = vpop.f32.mrb[0].mxu1 }
  0xe9   :  { %v291_v35 = vcombine.high %v140_v32, %v140_v32  ;;  %v298_v36 = vrot.slane %v140_v32, %v297_v30  ;;  %v251_v38 = vpop.f32.mrb[1].mxu1  ;;  %v945_v49 = vadd.f32 %v720_v34, %v668_v39 }
  0xea   :  { %v942_v46 = vadd.f32 %v668_v39, %v251_v38 }
  0xeb   :  { %v305_v40 = vrot.slane %v291_v35, %v297_v30  ;;  %v306_v41 = vcombine.high %v298_v36, %v298_v36  ;;  %v314_v42 = vrot.slane %v298_v36, %v297_v30 }
  0xec   :  { %v723_v43 = vpop.f32.mrb[2].mxu1 }
  0xed   :  { %v307_v44 = vcombine.high %v305_v40, %v305_v40  ;;  %v328_v45 = vrot.slane %v306_v41, %v297_v30  ;;  %v343_v47 = vrot.slane %v314_v42, %v937_v37  ;;  %v261_v48 = vpop.f32.mrb[3].mxu1  ;;  %v336_v51 = vcombine.high %v314_v42, %v314_v42 }
  0xee   :  { %v947_v50 = vadd.f32 %v668_v39, %v261_v48  ;;  %v321_v52 = vrot.slane %v305_v40, %v297_v30  ;;  %v951_v57 = vadd.f32 %v723_v43, %v668_v39 }
  0xef   :  { %v347_v53 = vrot.slane %v328_v45, %v937_v37  ;;  %v380_v54 = vadd.f32 %v343_v47, %v942_v46  ;;  %v338_v55 = vcombine.high %v328_v45, %v328_v45  ;;  %v335_v56 = vrot.slane %v307_v44, %v297_v30 }
  0xf0   :  { %v351_v58 = vrot.slane %v336_v51, %v937_v37  ;;  %v726_v59 = vpop.f32.mrb[4].mxu1  ;;  %v359_v60 = vrot.slane %v321_v52, %v937_v37  ;;  %v337_v61 = vcombine.high %v321_v52, %v321_v52  ;;  %v445_v45 = vand.u32 127, %v295_v26 }
  0xf1   :  { %v381_v62 = vadd.f32 %v347_v53, %v945_v49  ;;  %756 = vtanh.f32 %v380_v54  ;;  %v355_v63 = vrot.slane %v338_v55, %v937_v37  ;;  %v957_v0 = vadd.f32 %v726_v59, %v668_v39  ;;  %v271_v1 = vpop.f32.mrb[5].mxu1 }
  0xf2   :  { %v382_v2 = vadd.f32 %v351_v58, %v947_v50  ;;  %v363_v3 = vrot.slane %v335_v56, %v937_v37  ;;  %v961_v4 = vadd.f32 %v668_v39, %v271_v1  ;;  %v339_v5 = vcombine.high %v335_v56, %v335_v56 }
  0xf3   :  { %758 = vtanh.f32 %v381_v62  ;;  %v383_v6 = vadd.f32 %v355_v63, %v951_v57  ;;  %v367_v14 = vrot.slane %v337_v61, %v937_v37  ;;  %v448_v48 = vsub.s32 %v445_v45, %v930_v28 }
  0xf4   :  { %760 = vtanh.f32 %v382_v2  ;;  %v385_v7 = vadd.f32 %v363_v3, %v957_v0  ;;  %v384_v8 = vadd.f32 %v359_v60, %v961_v4  ;;  %v729_v9 = vpop.f32.mrb[6].mxu1  ;;  %v371_v10 = vrot.slane %v339_v5, %v937_v37 }
  0xf5   :  { %762 = vtanh.f32 %v383_v6  ;;  %v967_v11 = vadd.f32 %v729_v9, %v668_v39  ;;  %v281_v12 = vpop.f32.mrb[7].mxu1  ;;  %v39_v6 = vld [vmem:[%s1056_s2] sm:$0xff]  ;;  %s804_s2 = smov 8  }
  0xf6   :  { %v969_v13 = vadd.f32 %v668_v39, %v281_v12  ;;  %764 = vtanh.f32 %v384_v8  ;;  %vm435_vm11 = vcmp.ne.s32.totalorder %v39_v6, 0 }
  0xf7   :  { %766 = vtanh.f32 %v385_v7  ;;  %v387_v15 = vadd.f32 %v371_v10, %v967_v11 }
  0xf8   :  { %v386_v16 = vadd.f32 %v367_v14, %v969_v13 }
  0xfa   :  { %768 = vtanh.f32 %v386_v16 }
  0xfb   :  { %v757_v18 = vpop.eup %756  ;;  %770 = vtanh.f32 %v387_v15 }
  0xfc   :  { %v402_v19 = vmul.f32 %v757_v18, %v681_v17 }
  0xfd   :  { %v759_v20 = vpop.eup %758 }
  0xfe   :  { %v761_v21 = vpop.eup %760  ;;  %v411_v22 = vsel %vm410_vm3, %v402_v19, 0.0  ;;  %v403_v23 = vmul.f32 %v759_v20, %v681_v17 }
  0xff   :  { %v763_v24 = vpop.eup %762  ;;  %412 = vadd.xlane.f32.xlu0 %v411_v22  ;;  %v404_v25 = vmul.f32 %v761_v21, %v681_v17  ;;  %v515_v22 = vsub.s32 1, %v930_v28 }
 0x100   :  { %v765_v27 = vpop.eup %764  ;;  %v405_v30 = vmul.f32 %v763_v24, %v681_v17  ;;  %v414_v32 = vsel %vm410_vm3, %v403_v23, 0.0 }
 0x101   :  { %v417_v29 = vsel %vm410_vm3, %v404_v25, 0.0  ;;  %v767_v31 = vpop.eup %766  ;;  %v406_v33 = vmul.f32 %v765_v27, %v681_v17 }
 0x102   :  { %418 = vadd.xlane.f32.xlu1 %v417_v29  ;;  %v420_v35 = vsel %vm410_vm3, %v405_v30, 0.0  ;;  %v407_v36 = vmul.f32 %v767_v31, %v681_v17  ;;  %v522_v29 = vsub.s32 2, %v930_v28  ;;  %v536_v30 = vsub.s32 4, %v930_v28 }
 0x103   :  { %415 = vadd.xlane.f32.xlu0 %v414_v32  ;;  %v423_v39 = vsel %vm410_vm3, %v406_v33, 0.0  ;;  %v529_v33 = vsub.s32 3, %v930_v28 }
 0x104   :  { %v769_v34 = vpop.eup %768  ;;  %v426_v41 = vsel %vm410_vm3, %v407_v36, 0.0  ;;  %v543_v36 = vsub.s32 5, %v930_v28 }
 0x105   :  { %v771_v38 = vpop.eup %770  ;;  %v408_v40 = vmul.f32 %v769_v34, %v681_v17  ;;  %v550_v34 = vsub.s32 6, %v930_v28 }
 0x106   :  { %421 = vadd.xlane.f32.xlu1 %v420_v35  ;;  %v409_v42 = vmul.f32 %v771_v38, %v681_v17 }
 0x107   :  { %424 = vadd.xlane.f32.xlu0 %v423_v39  ;;  %v429_v43 = vsel %vm410_vm3, %v408_v40, 0.0  ;;  %v557_v39 = vsub.s32 7, %v930_v28 }
 0x108   :  { %v432_v44 = vsel %vm410_vm3, %v409_v42, 0.0 }
 0x10a   :  { %427 = vadd.xlane.f32.xlu1 %v426_v41 }
 0x10b   :  { %430 = vadd.xlane.f32.xlu0 %v429_v43 }
 0x10e   :  { %433 = vadd.xlane.f32.xlu1 %v432_v44 }
 0x18c   :  { %v413_v47 = vpop.xlane.xlu0 %412 }
 0x18d   :  { %v449_v53 = vrot.slane %v413_v47, %v448_v48 }
 0x18f   :  { %v419_v51 = vpop.xlane.xlu1 %418 }
 0x190   :  { %v416_v52 = vpop.xlane.xlu0 %415  ;;  %v457_v55 = vrot.slane %v419_v51, %v448_v48 }
 0x191   :  { %v453_v54 = vrot.slane %v416_v52, %v448_v48 }
 0x193   :  { %v479_v56 = vsel %vm478_vm4, %v453_v54, %v449_v53  ;;  %v422_v58 = vpop.xlane.xlu1 %421 }
 0x194   :  { %v481_v59 = vsel %vm480_vm5, %v457_v55, %v479_v56  ;;  %v461_v60 = vrot.slane %v422_v58, %v448_v48  ;;  %v425_v61 = vpop.xlane.xlu0 %424 }
 0x195   :  { %v465_v26 = vrot.slane %v425_v61, %v448_v48 }
 0x196   :  { %v483_v62 = vsel %vm482_vm6, %v461_v60, %v481_v59 }
 0x197   :  { %v485_v63 = vsel %vm484_vm7, %v465_v26, %v483_v62  ;;  %v428_v1 = vpop.xlane.xlu1 %427 }
 0x198   :  { %v469_v2 = vrot.slane %v428_v1, %v448_v48  ;;  %v431_v3 = vpop.xlane.xlu0 %430 }
 0x199   :  { %v473_v5 = vrot.slane %v431_v3, %v448_v48 }
 0x19a   :  { %v487_v7 = vsel %vm486_vm8, %v469_v2, %v485_v63 }
 0x19b   :  { %v434_v8 = vpop.xlane.xlu1 %433  ;;  %v489_v9 = vsel %vm488_vm9, %v473_v5, %v487_v7 }
 0x19c   :  { %v477_v10 = vrot.slane %v434_v8, %v448_v48 }
 0x19e   :  { %v491_v12 = vsel %vm490_vm10, %v477_v10, %v489_v9 }
 0x19f   :  { %v493_v14 = vsel %vm435_vm11, -inf, %v491_v12 }
 0x1a0   :  { %v495_v15 = vsel %vm494_vm12, %v493_v14, -inf }
 0x1a1   :  { %496 = vmax.xlane.f32.xlu0 %v495_v15 }
 0x22e   :  { %v497_v16 = vpop.xlane.xlu0 %496 }
 0x22f   :  { %v498_v17 = vsub.f32 %v493_v14, %v497_v16 }
 0x231   :  { %v499_v18 = vmul.f32 1.442695, %v498_v17 }
 0x233   :  { %772 = vpow2.f32 %v499_v18 }
 0x23d   :  { %v773_v19 = vpop.eup %772 }
 0x23e   :  { %v501_v20 = vsel %vm494_vm12, %v773_v19, 0.0 }
 0x23f   :  { %502 = vadd.xlane.f32.xlu1 %v501_v20 }
 0x2cc   :  { %v503_v21 = vpop.xlane.xlu1 %502 }
 0x2cd   :  { %774 = vrcp.f32 %v503_v21 }
 0x2d7   :  { %v775_v23 = vpop.eup %774 }
 0x2d8   :  { %v1000_v24 = vmul.f32 %v775_v23, %v773_v19 }
 0x2da   :  { %v516_v25 = vrot.slane %v1000_v24, %v515_v22  ;;  %v509_v27 = vrot.slane %v1000_v24, %v937_v37  ;;  %v523_v31 = vrot.slane %v1000_v24, %v522_v29  ;;  %v537_v32 = vrot.slane %v1000_v24, %v536_v30 }
 0x2db   :  { %v530_v35 = vrot.slane %v1000_v24, %v529_v33  ;;  %v551_v37 = vrot.slane %v1000_v24, %v550_v34  ;;  %v544_v38 = vrot.slane %v1000_v24, %v543_v36  ;;  %v558_v40 = vrot.slane %v1000_v24, %v557_v39 }
 0x2dc   :  { %518 = vbcast.lane.b32.xlu1 %v516_v25, 256  ;;  %511 = vbcast.lane.b32.xlu0 %v509_v27, 256 }
 0x2e0   :  { %525 = vbcast.lane.b32.xlu1 %v523_v31, 256  ;;  %539 = vbcast.lane.b32.xlu0 %v537_v32, 256 }
 0x2e4   :  { %532 = vbcast.lane.b32.xlu1 %v530_v35, 256  ;;  %553 = vbcast.lane.b32.xlu0 %v551_v37, 256 }
 0x2e8   :  { %546 = vbcast.lane.b32.xlu1 %v544_v38, 256 }
 0x2ec   :  { %560 = vbcast.lane.b32.xlu1 %v558_v40, 256 }
 0x34e   :  { %v519_v41 = vpop.permute.xlu1 %518  ;;  %v512_v42 = vpop.permute.xlu0 %511 }
 0x34f   :  { %v563_v43 = vmul.f32 %v519_v41, %v945_v49  ;;  %v562_v44 = vmul.f32 %v512_v42, %v942_v46 }
 0x351   :  { %v577_v45 = vsel %vm410_vm3, %v563_v43, 0.0  ;;  %v570_v47 = vsel %vm410_vm3, %v562_v44, 0.0 }
 0x352   :  { %v578_v48 = vrot.slane %v577_v45, 4  ;;  %v571_v51 = vrot.slane %v570_v47, 4  ;;  %v526_v52 = vpop.permute.xlu1 %525  ;;  %v540_v53 = vpop.permute.xlu0 %539 }
 0x353   :  { %v564_v28 = vmul.f32 %v526_v52, %v947_v50  ;;  %v566_v54 = vmul.f32 %v540_v53, %v961_v4 }
 0x354   :  { %v579_v55 = vadd.f32 %v578_v48, %v577_v45  ;;  %v572_v56 = vadd.f32 %v571_v51, %v570_v47 }
 0x355   :  { %v584_v58 = vsel %vm410_vm3, %v564_v28, 0.0  ;;  %v598_v49 = vsel %vm410_vm3, %v566_v54, 0.0 }
 0x356   :  { %v580_v59 = vrot.slane %v579_v55, 2  ;;  %v573_v46 = vrot.slane %v572_v56, 2  ;;  %v585_v60 = vrot.slane %v584_v58, 4  ;;  %v599_v61 = vrot.slane %v598_v49, 4  ;;  %v533_v26 = vpop.permute.xlu1 %532  ;;  %v554_v62 = vpop.permute.xlu0 %553 }
 0x357   :  { %v565_v63 = vmul.f32 %v533_v26, %v951_v57  ;;  %v568_v1 = vmul.f32 %v554_v62, %v969_v13 }
 0x358   :  { %v581_v2 = vadd.f32 %v580_v59, %v579_v55  ;;  %v586_v50 = vadd.f32 %v585_v60, %v584_v58  ;;  %v600_v3 = vadd.f32 %v599_v61, %v598_v49  ;;  %v574_v4 = vadd.f32 %v573_v46, %v572_v56 }
 0x359   :  { %v591_v5 = vsel %vm410_vm3, %v565_v63, 0.0  ;;  %v612_v6 = vsel %vm410_vm3, %v568_v1, 0.0 }
 0x35a   :  { %v587_v7 = vrot.slane %v586_v50, 2  ;;  %v547_v8 = vpop.permute.xlu1 %546  ;;  %v601_v9 = vrot.slane %v600_v3, 2  ;;  %v592_v10 = vrot.slane %v591_v5, 4  ;;  %v613_v12 = vrot.slane %v612_v6, 4 }
 0x35b   :  { %v567_v14 = vmul.f32 %v547_v8, %v957_v0  ;;  %v582_v15 = vrot.slane %v581_v2, 1  ;;  %v575_v57 = vrot.slane %v574_v4, 1 }
 0x35c   :  { %v588_v16 = vadd.f32 %v587_v7, %v586_v50  ;;  %v593_v17 = vadd.f32 %v592_v10, %v591_v5  ;;  %v614_v13 = vadd.f32 %v613_v12, %v612_v6  ;;  %v602_v22 = vadd.f32 %v601_v9, %v600_v3 }
 0x35d   :  { %v605_v18 = vsel %vm410_vm3, %v567_v14, 0.0  ;;  %v583_v30 = vadd.f32 %v582_v15, %v581_v2  ;;  %v576_v31 = vadd.f32 %v575_v57, %v574_v4 }
 0x35e   :  { %v589_v19 = vrot.slane %v588_v16, 1  ;;  %v606_v20 = vrot.slane %v605_v18, 4  ;;  %v561_v21 = vpop.permute.xlu1 %560  ;;  %v594_v23 = vrot.slane %v593_v17, 2  ;;  %v615_v25 = vrot.slane %v614_v13, 2 }
 0x35f   :  { %v569_v27 = vmul.f32 %v561_v21, %v967_v11  ;;  %v603_v37 = vrot.slane %v602_v22, 1  ;;  %v634_v41 = vsel %vm478_vm4, %v583_v30, %v576_v31 }
 0x360   :  { %v607_v29 = vadd.f32 %v606_v20, %v605_v18  ;;  %v595_v32 = vadd.f32 %v594_v23, %v593_v17  ;;  %v590_v33 = vadd.f32 %v589_v19, %v588_v16  ;;  %v616_v38 = vadd.f32 %v615_v25, %v614_v13 }
 0x361   :  { %v619_v0 = vsel %vm410_vm3, %v569_v27, 0.0  ;;  %v604_v45 = vadd.f32 %v603_v37, %v602_v22 }
 0x362   :  { %v608_v34 = vrot.slane %v607_v29, 2  ;;  %v620_v35 = vrot.slane %v619_v0, 4  ;;  %v596_v36 = vrot.slane %v595_v32, 1  ;;  %v635_v43 = vsel %vm480_vm5, %v590_v33, %v634_v41 }
 0x363   :  { %v617_v47 = vrot.slane %v616_v38, 1 }
 0x364   :  { %v609_v39 = vadd.f32 %v608_v34, %v607_v29  ;;  %v621_v40 = vadd.f32 %v620_v35, %v619_v0  ;;  %v597_v42 = vadd.f32 %v596_v36, %v595_v32 }
 0x365   :  { %v618_v55 = vadd.f32 %v617_v47, %v616_v38 }
 0x366   :  { %v610_v11 = vrot.slane %v609_v39, 1  ;;  %v622_v44 = vrot.slane %v621_v40, 2  ;;  %v636_v48 = vsel %vm482_vm6, %v597_v42, %v635_v43 }
 0x367   :  { %v637_v53 = vsel %vm484_vm7, %v604_v45, %v636_v48 }
 0x368   :  { %v611_v51 = vadd.f32 %v610_v11, %v609_v39  ;;  %v623_v52 = vadd.f32 %v622_v44, %v621_v40 }
 0x36a   :  { %v624_v28 = vrot.slane %v623_v52, 1  ;;  %v638_v54 = vsel %vm486_vm8, %v611_v51, %v637_v53 }
 0x36b   :  { %v639_v58 = vsel %vm488_vm9, %v618_v55, %v638_v54 }
 0x36c   :  { %v625_v56 = vadd.f32 %v624_v28, %v623_v52 }
 0x36e   :  { %v640_v49 = vsel %vm490_vm10, %v625_v56, %v639_v58 }
 0x36f   :  { %641 = vrot.lane.b32.xlu0 %v640_v49, %s804_s2 }
 0x3e1   :  { %v642_v59 = vpop.permute.xlu0 %641 }
 0x3e2   :  { %v644_v46 = vsel %vm494_vm12, %v1000_v24, %v642_v59 }
 0x3e3   :  { %v646_v60 = vsel %vm645_vm13, %v644_v46, 0.0 }
 0x3e4   :  { %647 = vst [vmem:[#allocation2] sm:$0xff] %v646_v60 }
 0x3e5   :  { %787 = shalt.err (!%p784_p4)
}
 0x3e6   :  { %s788_s22 = scalar_lea.hbm %s1062_s8, 128 }
 0x3e7   :  { %p789_p5 = scmp.ne.s32.totalorder %s1062_s8, %s788_s22  ;;  %p792_p6 = scmp.lt.u32.totalorder %s788_s22, %s1062_s8 }
 0x3e9   :  { %p794_p7 = pnand %p792_p6, %p789_p5 }
 0x3eb   :  { %797 = shalt.err (!%p794_p7)
}
 0x3ec   :  { %657 = dma.vmem_to_hbm [thread:$0]  %s655_s19, 128, %s1062_s8, [#allocation3]  }
 0x3ed   :  { %798 = dma.done.wait [#allocation3], 128  }
 0x3ee   :  { %799 = vsyncadd [#allocation3], 4294967168 }
 0x3ef   :  { %661 = vsyncpa [#allocation3], 1 }

// kernel: tpu_custom_call.1
= control target key start
LH: loop header
LB: loop body
LE: loop exit
PB: predicated region body
PF: predicated region fallthrough
CT: control target
= control target key end

     0   :  { %15 = vsyncpa [#allocation3], 0  ;;  %vm60_vm0 = vcmask 31744   ;;  %v837_v3 = vmov 0.0|0.0   ;;  %vm838_vm2 = vmmov 0   ;;  %v839_v10 = vmov 0.0   ;;  %s1098_s0 = inlined_call_operand.vmem [shape: f32[8,4], index: 0, kind: input, shape index: {}]   ;;  %s1099_s1 = inlined_call_operand.vmem [shape: f32[64,4], index: 1, kind: input, shape index: {}]   ;;  %s1100_s2 = inlined_call_operand.vmem [shape: s32[8,8], index: 2, kind: input, shape index: {}]   ;;  %s1101_s3 = inlined_call_operand.vmem [shape: f32[32,4], index: 3, kind: input, shape index: {}]   ;;  %s1102_s4 = inlined_call_operand.vmem [shape: f32[1,32], index: 4, kind: input, shape index: {}]   ;;  %s1103_s5 = inlined_call_operand.vmem [shape: f32[32,4], index: 5, kind: input, shape index: {}]   ;;  %s1104_s6 = inlined_call_operand.vmem [shape: f32[1,32], index: 6, kind: input, shape index: {}]   ;;  %s1105_s7 = inlined_call_operand.vmem [shape: f32[1,32], index: 7, kind: input, shape index: {}]   ;;  %s1106_s8 = inlined_call_operand.hbm [shape: f32[8,32], index: 8, kind: output, shape index: {0}]   ;;  %s1107_s9 = inlined_call_operand.hbm [shape: f32[8,8], index: 9, kind: output, shape index: {1}]  }
   0x1   :  { %v43_v0 = vld [vmem:[%s1101_s3] sm:$0xff]  ;;  %v44_v1 = vld [vmem:[%s1101_s3 + $0x8] sm:$0xff]  ;;  %743 = vmatprep.subr.bf16.mxu0 %v837_v3  ;;  %vm904_vm1 = vmpackc.low %vm60_vm0, %vm60_vm0  ;;  %720 = vmatprep.mubr.msk.f32.mxu0 %vm838_vm2, %v839_v10 }
   0x2   :  { %v47_v2 = vld [vmem:[%s1103_s5] sm:$0xff]  ;;  %v744_v4 = vpack.c.bf16 %v44_v1, %v43_v0  ;;  %v48_v6 = vld [vmem:[%s1103_s5 + $0x8] sm:$0xff]  ;;  %v49_v8 = vld [vmem:[%s1103_s5 + $0x10] sm:$0xff] }
   0x3   :  { %v751_v7 = vpack.c.bf16 %v48_v6, %v47_v2  ;;  %v50_v9 = vld [vmem:[%s1103_s5 + $0x18] sm:$0xff]  ;;  %v34_v12 = vld [vmem:[%s1099_s1] sm:$0xff]  ;;  %v45_v13 = vld [vmem:[%s1101_s3 + $0x10] sm:$0xff] }
   0x4   :  { %746 = vmatpush3.bf16.xpose.msk.msra.mxu0 %vm904_vm1, %v744_v4  ;;  %v757_v11 = vpack.c.bf16 %v50_v9, %v49_v8  ;;  %v46_v14 = vld [vmem:[%s1101_s3 + $0x18] sm:$0xff]  ;;  %731 = vmatprep.mubr.msk.f32.mxu1 %vm60_vm0, %v34_v12 }
   0x5   :  { %753 = vmatprep.subr.msk.bf16.mxu1 %vm904_vm1, %v751_v7  ;;  %747 = vmatprep.subr.bf16.mxu0 %v837_v3 }
   0x6   :  { %756 = vmatpush3.bf16.xpose.msk.msra.mxu1 %vm904_vm1, %v751_v7 }
   0x7   :  { %759 = vmatprep.subr.msk.bf16.mxu1 %vm904_vm1, %v757_v11 }
   0x8   :  { %16 = vsyncpa [#allocation5], 0  ;;  %v748_v15 = vpack.c.bf16 %v46_v14, %v45_v13  ;;  %v33_v16 = vld [vmem:[%s1098_s0] sm:$0xff]  ;;  %v35_v17 = vld [vmem:[%s1099_s1 + $0x8] sm:$0xff]  ;;  %v840_v24 = vmov 1966171168   ;;  %v298_v26 = vlaneseq }
   0x9   :  { %v36_v18 = vld [vmem:[%s1099_s1 + $0x10] sm:$0xff]  ;;  %v37_v19 = vld [vmem:[%s1099_s1 + $0x18] sm:$0xff]  ;;  %v38_v20 = vld [vmem:[%s1099_s1 + $0x20] sm:$0xff]  ;;  %v296_v25 = vunpack.c.l.s4 %v840_v24  ;;  %vm413_vm3 = vcmask 261120   ;;  %vm481_vm4 = vcmask 1041409   ;;  %vm483_vm5 = vcmask 1042434  }
   0xa   :  { %v39_v21 = vld [vmem:[%s1099_s1 + $0x28] sm:$0xff]  ;;  %v40_v22 = vld [vmem:[%s1099_s1 + $0x30] sm:$0xff]  ;;  %v41_v23 = vld [vmem:[%s1099_s1 + $0x38] sm:$0xff]  ;;  %v972_v28 = vshrl.u32 %v298_v26, 7  ;;  %vm485_vm6 = vcmask 1043459   ;;  %vm487_vm7 = vcmask 1044484  }
   0xb   :  { %v297_v27 = vunpack.c.0.s8 %v296_v25  ;;  %v675_v29 = vld [vmem:[%s1102_s4] ss:$0 sm:$0xff]  ;;  %vm489_vm8 = vcmask 1045509   ;;  %vm491_vm9 = vcmask 1046534   ;;  %vm493_vm10 = vcmask 1047559  }
   0xc   :  { %750 = vmatpush3.bf16.xpose.msk.msra.mxu0 %vm904_vm1, %v748_v15  ;;  %v979_v37 = vsub.s32 0, %v972_v28  ;;  %v681_v39 = vld [vmem:[%s1104_s6] ss:$0 sm:$0xff]  ;;  %vm497_vm12 = vcmask 64512  }
   0xd   :  { %v300_v30 = vsub.s32 %v297_v27, %v972_v28 }
   0xe   :  { %762 = vmatpush3.bf16.xpose.msk.msra.mxu1 %vm904_vm1, %v757_v11 }
  0x13   :  { %721 = vmatmul.mubr.msk.f32.vlgmr.msra.gmra.mrb[0].mxu0 %vm60_vm0, %v33_v16 }
  0x15   :  { %732 = vmatmul.mubr.msk.f32.vlgmr.msra.gmra.mrb[0].mxu1 %vm60_vm0, %v35_v17  ;;  %v694_v17 = vld [vmem:[%s1105_s7] ss:$0 sm:$0xff] }
  0x16   :  { %734 = vmatprep.mubr.msk.f32.mxu1 %vm60_vm0, %v36_v18 }
  0x19   :  { %735 = vmatmul.mubr.msk.f32.gmra.mrb[2].mxu1 %vm60_vm0, %v37_v19 }
  0x1a   :  { %737 = vmatprep.mubr.msk.f32.mxu1 %vm60_vm0, %v38_v20 }
  0x1d   :  { %738 = vmatmul.mubr.msk.f32.gmra.mrb[4].mxu1 %vm60_vm0, %v39_v21 }
  0x1e   :  { %740 = vmatprep.mubr.msk.f32.mxu1 %vm60_vm0, %v40_v22 }
  0x21   :  { %741 = vmatmul.mubr.msk.f32.gmra.mrb[6].mxu1 %vm60_vm0, %v41_v23 }
  0xe6   :  { %v142_v31 = vpop.f32.mrb[0].mxu0 }
  0xe7   :  { %v143_v32 = vadd.f32 %v675_v29, %v142_v31  ;;  %v722_v33 = vpop.f32.mrb[1].mxu0 }
  0xe8   :  { %v733_v34 = vpop.f32.mrb[0].mxu1 }
  0xe9   :  { %v294_v35 = vcombine.high %v143_v32, %v143_v32  ;;  %v301_v36 = vrot.slane %v143_v32, %v300_v30  ;;  %v254_v38 = vpop.f32.mrb[1].mxu1  ;;  %v987_v49 = vadd.f32 %v733_v34, %v681_v39 }
  0xea   :  { %v984_v46 = vadd.f32 %v681_v39, %v254_v38 }
  0xeb   :  { %v308_v40 = vrot.slane %v294_v35, %v300_v30  ;;  %v309_v41 = vcombine.high %v301_v36, %v301_v36  ;;  %v317_v42 = vrot.slane %v301_v36, %v300_v30 }
  0xec   :  { %v736_v43 = vpop.f32.mrb[2].mxu1 }
  0xed   :  { %v310_v44 = vcombine.high %v308_v40, %v308_v40  ;;  %v331_v45 = vrot.slane %v309_v41, %v300_v30  ;;  %v346_v47 = vrot.slane %v317_v42, %v979_v37  ;;  %v264_v48 = vpop.f32.mrb[3].mxu1  ;;  %v339_v51 = vcombine.high %v317_v42, %v317_v42 }
  0xee   :  { %v989_v50 = vadd.f32 %v681_v39, %v264_v48  ;;  %v324_v52 = vrot.slane %v308_v40, %v300_v30  ;;  %v993_v57 = vadd.f32 %v736_v43, %v681_v39 }
  0xef   :  { %v350_v53 = vrot.slane %v331_v45, %v979_v37  ;;  %v383_v54 = vadd.f32 %v346_v47, %v984_v46  ;;  %v341_v55 = vcombine.high %v331_v45, %v331_v45  ;;  %v338_v56 = vrot.slane %v310_v44, %v300_v30 }
  0xf0   :  { %v354_v58 = vrot.slane %v339_v51, %v979_v37  ;;  %v739_v59 = vpop.f32.mrb[4].mxu1  ;;  %v362_v60 = vrot.slane %v324_v52, %v979_v37  ;;  %v340_v61 = vcombine.high %v324_v52, %v324_v52  ;;  %v448_v45 = vand.u32 127, %v298_v26 }
  0xf1   :  { %v384_v62 = vadd.f32 %v350_v53, %v987_v49  ;;  %769 = vtanh.f32 %v383_v54  ;;  %v358_v63 = vrot.slane %v341_v55, %v979_v37  ;;  %v999_v0 = vadd.f32 %v739_v59, %v681_v39  ;;  %v274_v1 = vpop.f32.mrb[5].mxu1 }
  0xf2   :  { %v385_v2 = vadd.f32 %v354_v58, %v989_v50  ;;  %v366_v3 = vrot.slane %v338_v56, %v979_v37  ;;  %v1003_v4 = vadd.f32 %v681_v39, %v274_v1  ;;  %v342_v5 = vcombine.high %v338_v56, %v338_v56 }
  0xf3   :  { %771 = vtanh.f32 %v384_v62  ;;  %v386_v6 = vadd.f32 %v358_v63, %v993_v57  ;;  %v370_v14 = vrot.slane %v340_v61, %v979_v37  ;;  %v451_v48 = vsub.s32 %v448_v45, %v972_v28 }
  0xf4   :  { %773 = vtanh.f32 %v385_v2  ;;  %v388_v7 = vadd.f32 %v366_v3, %v999_v0  ;;  %v387_v8 = vadd.f32 %v362_v60, %v1003_v4  ;;  %v742_v9 = vpop.f32.mrb[6].mxu1  ;;  %v374_v10 = vrot.slane %v342_v5, %v979_v37 }
  0xf5   :  { %775 = vtanh.f32 %v386_v6  ;;  %v1009_v11 = vadd.f32 %v742_v9, %v681_v39  ;;  %v284_v12 = vpop.f32.mrb[7].mxu1  ;;  %v42_v6 = vld [vmem:[%s1100_s2] sm:$0xff]  ;;  %s841_s2 = smov [#allocation4]  }
  0xf6   :  { %v1011_v13 = vadd.f32 %v681_v39, %v284_v12  ;;  %777 = vtanh.f32 %v387_v8  ;;  %vm438_vm11 = vcmp.ne.s32.totalorder %v42_v6, 0  ;;  %s663_s23 = sshll.u32 %s841_s2, 4  ;;  %s664_s23 = int_to_ptr.vmem [resolvable:$true] %s663_s23 }
  0xf7   :  { %779 = vtanh.f32 %v388_v7  ;;  %v390_v15 = vadd.f32 %v374_v10, %v1009_v11  ;;  %s789_s24 = scalar_lea.vmem %s664_s23, 128  ;;  %p794_p1 = scmp.lt.s32.totalorder %s664_s23, %s664_s23 }
  0xf8   :  { %v389_v16 = vadd.f32 %v370_v14, %v1011_v13  ;;  %p790_p0 = scmp.ne.s32.totalorder %s664_s23, %s789_s24  ;;  %p795_p2 = scmp.lt.s32.totalorder %s789_s24, %s789_s24 }
  0xfa   :  { %781 = vtanh.f32 %v389_v16  ;;  %p796_p3 = por %p795_p2, %p794_p1 }
  0xfb   :  { %v770_v18 = vpop.eup %769  ;;  %783 = vtanh.f32 %v390_v15 }
  0xfc   :  { %v405_v19 = vmul.f32 %v770_v18, %v694_v17  ;;  %p797_p4 = pnand %p796_p3, %p790_p0 }
  0xfd   :  { %v772_v20 = vpop.eup %771 }
  0xfe   :  { %v774_v21 = vpop.eup %773  ;;  %v414_v22 = vsel %vm413_vm3, %v405_v19, 0.0  ;;  %v406_v23 = vmul.f32 %v772_v20, %v694_v17 }
  0xff   :  { %v776_v24 = vpop.eup %775  ;;  %415 = vadd.xlane.f32.xlu0 %v414_v22  ;;  %v407_v25 = vmul.f32 %v774_v21, %v694_v17  ;;  %v518_v22 = vsub.s32 1, %v972_v28 }
 0x100   :  { %v778_v27 = vpop.eup %777  ;;  %v408_v30 = vmul.f32 %v776_v24, %v694_v17  ;;  %v417_v32 = vsel %vm413_vm3, %v406_v23, 0.0 }
 0x101   :  { %v420_v29 = vsel %vm413_vm3, %v407_v25, 0.0  ;;  %v780_v31 = vpop.eup %779  ;;  %v409_v33 = vmul.f32 %v778_v27, %v694_v17 }
 0x102   :  { %421 = vadd.xlane.f32.xlu1 %v420_v29  ;;  %v423_v35 = vsel %vm413_vm3, %v408_v30, 0.0  ;;  %v410_v36 = vmul.f32 %v780_v31, %v694_v17  ;;  %v525_v29 = vsub.s32 2, %v972_v28  ;;  %v539_v30 = vsub.s32 4, %v972_v28 }
 0x103   :  { %418 = vadd.xlane.f32.xlu0 %v417_v32  ;;  %v426_v39 = vsel %vm413_vm3, %v409_v33, 0.0  ;;  %v532_v33 = vsub.s32 3, %v972_v28 }
 0x104   :  { %v782_v34 = vpop.eup %781  ;;  %v429_v41 = vsel %vm413_vm3, %v410_v36, 0.0 }
 0x105   :  { %v784_v38 = vpop.eup %783  ;;  %v411_v40 = vmul.f32 %v782_v34, %v694_v17  ;;  %v553_v34 = vsub.s32 6, %v972_v28 }
 0x106   :  { %424 = vadd.xlane.f32.xlu1 %v423_v35  ;;  %v412_v42 = vmul.f32 %v784_v38, %v694_v17  ;;  %v546_v38 = vsub.s32 5, %v972_v28 }
 0x107   :  { %427 = vadd.xlane.f32.xlu0 %v426_v39  ;;  %v432_v43 = vsel %vm413_vm3, %v411_v40, 0.0  ;;  %v560_v39 = vsub.s32 7, %v972_v28 }
 0x108   :  { %v435_v44 = vsel %vm413_vm3, %v412_v42, 0.0 }
 0x10a   :  { %430 = vadd.xlane.f32.xlu1 %v429_v41 }
 0x10b   :  { %433 = vadd.xlane.f32.xlu0 %v432_v43 }
 0x10e   :  { %436 = vadd.xlane.f32.xlu1 %v435_v44 }
 0x18c   :  { %v416_v47 = vpop.xlane.xlu0 %415 }
 0x18d   :  { %v452_v53 = vrot.slane %v416_v47, %v451_v48 }
 0x18f   :  { %v422_v51 = vpop.xlane.xlu1 %421 }
 0x190   :  { %v419_v52 = vpop.xlane.xlu0 %418  ;;  %v460_v55 = vrot.slane %v422_v51, %v451_v48 }
 0x191   :  { %v456_v54 = vrot.slane %v419_v52, %v451_v48 }
 0x193   :  { %v482_v56 = vsel %vm481_vm4, %v456_v54, %v452_v53  ;;  %v425_v58 = vpop.xlane.xlu1 %424 }
 0x194   :  { %v484_v59 = vsel %vm483_vm5, %v460_v55, %v482_v56  ;;  %v464_v60 = vrot.slane %v425_v58, %v451_v48  ;;  %v428_v61 = vpop.xlane.xlu0 %427 }
 0x195   :  { %v468_v26 = vrot.slane %v428_v61, %v451_v48 }
 0x196   :  { %v486_v62 = vsel %vm485_vm6, %v464_v60, %v484_v59 }
 0x197   :  { %v488_v63 = vsel %vm487_vm7, %v468_v26, %v486_v62  ;;  %v431_v1 = vpop.xlane.xlu1 %430 }
 0x198   :  { %v472_v2 = vrot.slane %v431_v1, %v451_v48  ;;  %v434_v3 = vpop.xlane.xlu0 %433 }
 0x199   :  { %v476_v5 = vrot.slane %v434_v3, %v451_v48 }
 0x19a   :  { %v490_v7 = vsel %vm489_vm8, %v472_v2, %v488_v63 }
 0x19b   :  { %v437_v8 = vpop.xlane.xlu1 %436  ;;  %v492_v9 = vsel %vm491_vm9, %v476_v5, %v490_v7 }
 0x19c   :  { %v480_v10 = vrot.slane %v437_v8, %v451_v48 }
 0x19e   :  { %v494_v12 = vsel %vm493_vm10, %v480_v10, %v492_v9 }
 0x19f   :  { %v496_v14 = vsel %vm438_vm11, -inf, %v494_v12 }
 0x1a0   :  { %v498_v15 = vsel %vm497_vm12, %v496_v14, -inf }
 0x1a1   :  { %499 = vmax.xlane.f32.xlu0 %v498_v15 }
 0x22e   :  { %v500_v16 = vpop.xlane.xlu0 %499 }
 0x22f   :  { %v501_v17 = vsub.f32 %v496_v14, %v500_v16 }
 0x231   :  { %v502_v18 = vmul.f32 1.442695, %v501_v17 }
 0x233   :  { %785 = vpow2.f32 %v502_v18 }
 0x23d   :  { %v786_v19 = vpop.eup %785 }
 0x23e   :  { %v504_v20 = vsel %vm497_vm12, %v786_v19, 0.0 }
 0x23f   :  { %505 = vadd.xlane.f32.xlu1 %v504_v20 }
 0x2cc   :  { %v506_v21 = vpop.xlane.xlu1 %505 }
 0x2cd   :  { %787 = vrcp.f32 %v506_v21 }
 0x2d7   :  { %v788_v23 = vpop.eup %787 }
 0x2d8   :  { %v508_v24 = vmul.f32 %v788_v23, %v786_v19 }
 0x2da   :  { %646 = vst.msk [vmem:[#allocation4] sm:$0xff] %vm497_vm12, %v508_v24  ;;  %v519_v25 = vrot.slane %v508_v24, %v518_v22  ;;  %v512_v27 = vrot.slane %v508_v24, %v979_v37  ;;  %v526_v31 = vrot.slane %v508_v24, %v525_v29  ;;  %v540_v32 = vrot.slane %v508_v24, %v539_v30 }
 0x2db   :  { %v533_v35 = vrot.slane %v508_v24, %v532_v33  ;;  %v554_v36 = vrot.slane %v508_v24, %v553_v34  ;;  %v547_v37 = vrot.slane %v508_v24, %v546_v38  ;;  %v561_v40 = vrot.slane %v508_v24, %v560_v39 }
 0x2dc   :  { %521 = vbcast.lane.b32.xlu1 %v519_v25, 256  ;;  %514 = vbcast.lane.b32.xlu0 %v512_v27, 256 }
 0x2e0   :  { %528 = vbcast.lane.b32.xlu1 %v526_v31, 256  ;;  %542 = vbcast.lane.b32.xlu0 %v540_v32, 256 }
 0x2e4   :  { %535 = vbcast.lane.b32.xlu1 %v533_v35, 256  ;;  %556 = vbcast.lane.b32.xlu0 %v554_v36, 256 }
 0x2e8   :  { %549 = vbcast.lane.b32.xlu1 %v547_v37, 256 }
 0x2ec   :  { %563 = vbcast.lane.b32.xlu1 %v561_v40, 256 }
 0x2ed   :  { %800 = shalt.err (!%p797_p4)
}
 0x2ee   :  { %s801_s26 = scalar_lea.hbm %s1107_s9, 128 }
 0x2ef   :  { %p802_p5 = scmp.ne.s32.totalorder %s1107_s9, %s801_s26  ;;  %p805_p6 = scmp.lt.u32.totalorder %s801_s26, %s1107_s9 }
 0x2f1   :  { %p807_p7 = pnand %p805_p6, %p802_p5 }
 0x2f3   :  { %810 = shalt.err (!%p807_p7)
}
 0x2f4   :  { %666 = dma.vmem_to_hbm [thread:$0]  %s664_s23, 128, %s1107_s9, [#allocation5]  }
 0x2f5   :  { %s842_s9 = smov [#allocation2]  }
 0x2f6   :  { %s653_s11 = sshll.u32 %s842_s9, 4  ;;  %s654_s11 = int_to_ptr.vmem [resolvable:$true] %s653_s11 }
 0x2f7   :  { %s811_s12 = scalar_lea.vmem %s654_s11, 128  ;;  %p816_p9 = scmp.lt.s32.totalorder %s654_s11, %s654_s11 }
 0x2f8   :  { %p812_p8 = scmp.ne.s32.totalorder %s654_s11, %s811_s12  ;;  %p817_p10 = scmp.lt.s32.totalorder %s811_s12, %s811_s12 }
 0x2fa   :  { %p818_p11 = por %p817_p10, %p816_p9 }
 0x2fc   :  { %p819_p12 = pnand %p818_p11, %p812_p8 }
 0x34e   :  { %v522_v28 = vpop.permute.xlu1 %521  ;;  %v515_v41 = vpop.permute.xlu0 %514 }
 0x34f   :  { %v566_v42 = vmul.f32 %v522_v28, %v987_v49  ;;  %v565_v43 = vmul.f32 %v515_v41, %v984_v46 }
 0x351   :  { %v580_v44 = vsel %vm413_vm3, %v566_v42, 0.0  ;;  %v573_v45 = vsel %vm413_vm3, %v565_v43, 0.0 }
 0x352   :  { %v581_v47 = vrot.slane %v580_v44, 4  ;;  %v574_v48 = vrot.slane %v573_v45, 4  ;;  %v529_v51 = vpop.permute.xlu1 %528  ;;  %v543_v52 = vpop.permute.xlu0 %542 }
 0x353   :  { %v567_v53 = vmul.f32 %v529_v51, %v989_v50  ;;  %v569_v54 = vmul.f32 %v543_v52, %v1003_v4 }
 0x354   :  { %v582_v55 = vadd.f32 %v581_v47, %v580_v44  ;;  %v575_v56 = vadd.f32 %v574_v48, %v573_v45 }
 0x355   :  { %v587_v58 = vsel %vm413_vm3, %v567_v53, 0.0  ;;  %v601_v49 = vsel %vm413_vm3, %v569_v54, 0.0 }
 0x356   :  { %v583_v59 = vrot.slane %v582_v55, 2  ;;  %v576_v46 = vrot.slane %v575_v56, 2  ;;  %v588_v60 = vrot.slane %v587_v58, 4  ;;  %v602_v61 = vrot.slane %v601_v49, 4  ;;  %v536_v26 = vpop.permute.xlu1 %535  ;;  %v557_v62 = vpop.permute.xlu0 %556 }
 0x357   :  { %v568_v63 = vmul.f32 %v536_v26, %v993_v57  ;;  %v571_v1 = vmul.f32 %v557_v62, %v1011_v13 }
 0x358   :  { %v584_v2 = vadd.f32 %v583_v59, %v582_v55  ;;  %v589_v50 = vadd.f32 %v588_v60, %v587_v58  ;;  %v603_v3 = vadd.f32 %v602_v61, %v601_v49  ;;  %v577_v4 = vadd.f32 %v576_v46, %v575_v56 }
 0x359   :  { %v594_v5 = vsel %vm413_vm3, %v568_v63, 0.0  ;;  %v615_v6 = vsel %vm413_vm3, %v571_v1, 0.0 }
 0x35a   :  { %v590_v7 = vrot.slane %v589_v50, 2  ;;  %v550_v8 = vpop.permute.xlu1 %549  ;;  %v604_v9 = vrot.slane %v603_v3, 2  ;;  %v595_v10 = vrot.slane %v594_v5, 4  ;;  %v616_v12 = vrot.slane %v615_v6, 4 }
 0x35b   :  { %v570_v14 = vmul.f32 %v550_v8, %v999_v0  ;;  %v585_v15 = vrot.slane %v584_v2, 1  ;;  %v578_v57 = vrot.slane %v577_v4, 1 }
 0x35c   :  { %v591_v16 = vadd.f32 %v590_v7, %v589_v50  ;;  %v596_v17 = vadd.f32 %v595_v10, %v594_v5  ;;  %v617_v13 = vadd.f32 %v616_v12, %v615_v6  ;;  %v605_v22 = vadd.f32 %v604_v9, %v603_v3 }
 0x35d   :  { %v608_v18 = vsel %vm413_vm3, %v570_v14, 0.0  ;;  %v586_v29 = vadd.f32 %v585_v15, %v584_v2  ;;  %v579_v30 = vadd.f32 %v578_v57, %v577_v4 }
 0x35e   :  { %v592_v19 = vrot.slane %v591_v16, 1  ;;  %v609_v20 = vrot.slane %v608_v18, 4  ;;  %v564_v21 = vpop.permute.xlu1 %563  ;;  %v597_v23 = vrot.slane %v596_v17, 2  ;;  %v618_v24 = vrot.slane %v617_v13, 2 }
 0x35f   :  { %v572_v25 = vmul.f32 %v564_v21, %v1009_v11  ;;  %v606_v35 = vrot.slane %v605_v22, 1  ;;  %v637_v40 = vsel %vm481_vm4, %v586_v29, %v579_v30 }
 0x360   :  { %v610_v27 = vadd.f32 %v609_v20, %v608_v18  ;;  %v598_v31 = vadd.f32 %v597_v23, %v596_v17  ;;  %v593_v32 = vadd.f32 %v592_v19, %v591_v16  ;;  %v619_v38 = vadd.f32 %v618_v24, %v617_v13 }
 0x361   :  { %v622_v0 = vsel %vm413_vm3, %v572_v25, 0.0  ;;  %v607_v43 = vadd.f32 %v606_v35, %v605_v22 }
 0x362   :  { %v611_v33 = vrot.slane %v610_v27, 2  ;;  %v623_v34 = vrot.slane %v622_v0, 4  ;;  %v599_v36 = vrot.slane %v598_v31, 1  ;;  %v638_v41 = vsel %vm483_vm5, %v593_v32, %v637_v40 }
 0x363   :  { %v620_v44 = vrot.slane %v619_v38, 1 }
 0x364   :  { %v612_v37 = vadd.f32 %v611_v33, %v610_v27  ;;  %v624_v39 = vadd.f32 %v623_v34, %v622_v0  ;;  %v600_v28 = vadd.f32 %v599_v36, %v598_v31 }
 0x365   :  { %v621_v54 = vadd.f32 %v620_v44, %v619_v38 }
 0x366   :  { %v613_v11 = vrot.slane %v612_v37, 1  ;;  %v625_v42 = vrot.slane %v624_v39, 2  ;;  %v639_v45 = vsel %vm485_vm6, %v600_v28, %v638_v41 }
 0x367   :  { %v640_v51 = vsel %vm487_vm7, %v607_v43, %v639_v45 }
 0x368   :  { %v614_v47 = vadd.f32 %v613_v11, %v612_v37  ;;  %v626_v48 = vadd.f32 %v625_v42, %v624_v39 }
 0x36a   :  { %v627_v52 = vrot.slane %v626_v48, 1  ;;  %v641_v53 = vsel %vm489_vm8, %v614_v47, %v640_v51 }
 0x36b   :  { %v642_v56 = vsel %vm491_vm9, %v621_v54, %v641_v53 }
 0x36c   :  { %v628_v55 = vadd.f32 %v627_v52, %v626_v48 }
 0x36e   :  { %v643_v58 = vsel %vm493_vm10, %v628_v55, %v642_v56 }
 0x36f   :  { %645 = vst.msk [vmem:[#allocation2] sm:$0xff] %vm413_vm3, %v643_v58 }
 0x370   :  { %822 = shalt.err (!%p819_p12)
}
 0x371   :  { %s823_s14 = scalar_lea.hbm %s1106_s8, 128 }
 0x372   :  { %p824_p13 = scmp.ne.s32.totalorder %s1106_s8, %s823_s14  ;;  %p827_p0 = scmp.lt.u32.totalorder %s823_s14, %s1106_s8 }
 0x374   :  { %p829_p1 = pnand %p827_p0, %p824_p13 }
 0x376   :  { %832 = shalt.err (!%p829_p1)
}
 0x377   :  { %656 = dma.vmem_to_hbm [thread:$0]  %s654_s11, 128, %s1106_s8, [#allocation3]  }
 0x378   :  { %833 = dma.done.wait [#allocation3], 128  }
 0x379   :  { %834 = vsyncadd [#allocation3], 4294967168 }
 0x37a   :  { %835 = dma.done.wait [#allocation5], 128  }
 0x37b   :  { %836 = vsyncadd [#allocation5], 4294967168 }
 0x37c   :  { %673 = vsyncpa [#allocation3], 1 }
 0x37d   :  { %674 = vsyncpa [#allocation5], 1 }

</bundles_post_ra>
